<compile_context>
chip_gen: v6e
topology: v6e:2x2x1
jax: 0.10.0
libtpu: 0.0.40
codegen_flags: <defaults>
</compile_context>

<pallas_src>
import jax
import jax.numpy as jnp
from jax.experimental import pallas as pl
from jax.experimental.pallas import tpu as pltpu


def _round_up(x, m):
    return ((x + m - 1) // m) * m


def _simclr_kernel(xi_ref, xj_ref, yhi_ref, yhj_ref, wbig_ref, w3_ref, b3_ref,
                   zi_ref, zj_ref):
    """One grid step: both augmented views of a tb-row batch tile."""
    w_big = wbig_ref[...]          # [dx, 64] bf16, VMEM-resident across steps
    w3 = w3_ref[...]               # [64, 32] bf16
    b3 = b3_ref[...]               # [1, 32]  f32

    def one_view(x_ref, yh_ref, z_ref):
        # f32 -> bf16 cast in-kernel (VPU work hidden under the input DMA).
        x = x_ref[...].astype(jnp.bfloat16)
        # Fused (linear backbone + Linear1 + Linear2): one bf16 dot, f32 acc;
        # the precomputed y-path / bias contribution is added per row.
        z = jnp.dot(x, w_big, preferred_element_type=jnp.float32) + yh_ref[...]
        z = jnp.maximum(z, 0.0)                                    # ReLU (f32)
        z = jnp.dot(z.astype(jnp.bfloat16), w3,
                    preferred_element_type=jnp.float32) + b3       # Linear3
        # F.normalize(z, dim=1), eps=1e-12  ==  z * rsqrt(max(sum(z^2), 1e-24))
        ss = jnp.sum(z * z, axis=1, keepdims=True)
        z_ref[...] = z * jax.lax.rsqrt(jnp.maximum(ss, 1e-24))

    one_view(xi_ref, yhi_ref, zi_ref)
    one_view(xj_ref, yhj_ref, zj_ref)


def simclr_stage1_forward(x_i, x_j, y_i, y_j, params, *, tb_max=1024):
    B = x_i.shape[0]
    xi = x_i.reshape(B, -1)     # metadata-only reshape (same as torch .view)
    xj = x_j.reshape(B, -1)
    yi = y_i.reshape(B, -1)
    yj = y_j.reshape(B, -1)
    dx = xi.shape[1]
    h1 = params["w2"].shape[1]        # 64
    out_dim = params["w3"].shape[1]   # 32

    # ---- host-side one-time weight algebra (tiny) ----
    # Linear1->Linear2 have no nonlinearity between them, and the stand-in
    # backbone is linear, so the whole pre-ReLU chain folds into one weight.
    # TODO(synk): if a real nonlinear backbone replaces the linear stand-in,
    # drop the wx @ w12 fold (the w1 @ w2 fusion itself stays valid).
    w12 = params["w1"] @ params["w2"]                       # [inp, 64] f32
    b12 = params["b1"] @ params["w2"] + params["b2"]        # [1, 64]   f32
    w_big = (params["wx"] @ w12).astype(jnp.bfloat16)       # [dx, 64]  bf16
    w3 = params["w3"].astype(jnp.bfloat16)
    b3 = params["b3"]

    # ---- tiny y-path precomputed host-side ([B,8] -> [B,64], negligible) ----
    yh_i = (yi @ params["wy"] + params["b_bb"]) @ w12 + b12   # [B, 64] f32
    yh_j = (yj @ params["wy"] + params["b_bb"]) @ w12 + b12

    # ---- batch tiling: minimal padding, bf16 sublane packing (mult. of 16) ----
    n_steps = max(1, pl.cdiv(B, tb_max))
    if B >= 32 and n_steps < 2:
        n_steps = 2                       # v7x: >=2 grid steps for 2 TCs
    tb = _round_up(pl.cdiv(B, n_steps), 16)
    rows_pad = _round_up(B, tb)
    if rows_pad > B:
        pad = ((0, rows_pad - B), (0, 0))
        xi, xj = jnp.pad(xi, pad), jnp.pad(xj, pad)
        yh_i, yh_j = jnp.pad(yh_i, pad), jnp.pad(yh_j, pad)
    grid = (rows_pad // tb,)

    row_spec = lambda i: (i, 0)
    const_spec = lambda i: (0, 0)

    z_i, z_j = pl.pallas_call(
        _simclr_kernel,
        out_shape=(jax.ShapeDtypeStruct((rows_pad, out_dim), jnp.float32),
                   jax.ShapeDtypeStruct((rows_pad, out_dim), jnp.float32)),
        grid=grid,
        in_specs=[
            # batch-tiled f32 inputs (double-buffered HBM->VMEM pipeline)
            pl.BlockSpec((tb, dx), row_spec),        # x_i rows
            pl.BlockSpec((tb, dx), row_spec),        # x_j rows
            pl.BlockSpec((tb, h1), row_spec),        # y-path contribution, view i
            pl.BlockSpec((tb, h1), row_spec),        # y-path contribution, view j
            # weights/biases: constant index_map -> stay resident across steps
            pl.BlockSpec((dx, h1), const_spec),      # fused weight (bf16)
            pl.BlockSpec((h1, out_dim), const_spec), # w3 (bf16)
            pl.BlockSpec((1, out_dim), const_spec),  # b3 (f32)
        ],
        out_specs=(pl.BlockSpec((tb, out_dim), row_spec),
                   pl.BlockSpec((tb, out_dim), row_spec)),
        compiler_params=pltpu.CompilerParams(
            dimension_semantics=("parallel",),       # shard batch over TCs (v7x)
            vmem_limit_bytes=48 * 1024 * 1024,       # safe on v5e/v6e/v7x
        ),
    )(xi, xj, yh_i, yh_j, w_big, w3, b3)

    return z_i[:B], z_j[:B]


def init_params(key, dx, dy, inp=128):
    """Deterministic init, PyTorch-Linear-style uniform(+-1/sqrt(fan_in))."""
    ks = jax.random.split(key, 10)

    def lin(k, fan_in, fan_out):
        bound = 1.0 / (fan_in ** 0.5)
        kw, kb = jax.random.split(k)
        w = jax.random.uniform(kw, (fan_in, fan_out), jnp.float32, -bound, bound)
        b = jax.random.uniform(kb, (1, fan_out), jnp.float32, -bound, bound)
        return w, b

    wx, b_bb = lin(ks[0], dx, inp)
    wy, _ = lin(ks[1], dy, inp)
    w1, b1 = lin(ks[2], inp, 64)
    w2, b2 = lin(ks[3], 64, 64)
    w3, b3 = lin(ks[4], 64, 32)
    return dict(wx=wx, wy=wy, b_bb=b_bb, w1=w1, b1=b1, w2=w2, b2=b2, w3=w3, b3=b3)


def _reference_forward(x_i, x_j, y_i, y_j, params):
    """Pure-JAX f32 reference with the original (unfused) op order."""
    B = x_i.shape[0]

    def backbone(x, y):
        return (x.reshape(B, -1) @ params["wx"]
                + y.reshape(B, -1) @ params["wy"] + params["b_bb"])

    def head(h):
        z = h @ params["w1"] + params["b1"]
        z = z @ params["w2"] + params["b2"]
        z = jnp.maximum(z, 0.0)
        z = z @ params["w3"] + params["b3"]
        n = jnp.sqrt(jnp.sum(z * z, axis=1, keepdims=True))
        return z / jnp.maximum(n, 1e-12)

    return head(backbone(x_i, y_i)), head(backbone(x_j, y_j))


if __name__ == "__main__":
    key = jax.random.PRNGKey(0)
    k_xi, k_xj, k_yi, k_yj, k_p = jax.random.split(key, 5)

    B, C, H, W = 2, 4, 16, 16     # NCHW image views
    DY = 8                        # auxiliary input dim for the backbone
    INP = 128                     # model.inp (backbone feature dim)

    x_i = jax.random.normal(k_xi, (B, C, H, W), jnp.float32)
    x_j = jax.random.normal(k_xj, (B, C, H, W), jnp.float32)
    y_i = jax.random.normal(k_yi, (B, DY), jnp.float32)
    y_j = jax.random.normal(k_yj, (B, DY), jnp.float32)

    # TODO(synk): the PyTorch backbone `model` is unspecified; a deterministic
    # linear encoder stands in for it (same stand-in as the reference above).
    params = init_params(k_p, dx=C * H * W, dy=DY, inp=INP)

    z_i, z_j = simclr_stage1_forward(x_i, x_j, y_i, y_j, params)
    jax.block_until_ready((z_i, z_j))

    # sanity: shapes, unit L2 norm along dim=1, and agreement with f32 reference
    assert z_i.shape == (B, 32) and z_j.shape == (B, 32)
    assert jnp.allclose(jnp.linalg.norm(z_i, axis=1), 1.0, atol=1e-5)
    assert jnp.allclose(jnp.linalg.norm(z_j, axis=1), 1.0, atol=1e-5)
    r_i, r_j = _reference_forward(x_i, x_j, y_i, y_j, params)
    assert jnp.allclose(z_i, r_i, atol=5e-2)   # bf16 MXU operands -> relaxed tol
    assert jnp.allclose(z_j, r_j, atol=5e-2)

    print("KERNEL_OK")
</pallas_src>

<mosaic_0001>
module attributes {stable_mosaic.version = 11 : i64} {
  func.func @_simclr_kernel(%arg0: i32, %arg1: memref<16x1024xf32, #tpu.memory_space<vmem>>, %arg2: memref<16x1024xf32, #tpu.memory_space<vmem>>, %arg3: memref<16x64xf32, #tpu.memory_space<vmem>>, %arg4: memref<16x64xf32, #tpu.memory_space<vmem>>, %arg5: memref<1024x64xbf16, #tpu.memory_space<vmem>>, %arg6: memref<64x32xbf16, #tpu.memory_space<vmem>>, %arg7: memref<1x32xf32, #tpu.memory_space<vmem>>, %arg8: memref<16x32xf32, #tpu.memory_space<vmem>>, %arg9: memref<16x32xf32, #tpu.memory_space<vmem>>) attributes {dimension_semantics = [#tpu.dimension_semantics<parallel>], iteration_bounds = array<i64: 1>, scalar_prefetch = 0 : i64, scratch_operands = 0 : i64, tpu.core_type = #tpu.core_type<tc>, window_params = [{transform_indices = @transform_0, window_bounds = array<i64: 16, 1024>}, {transform_indices = @transform_1, window_bounds = array<i64: 16, 1024>}, {transform_indices = @transform_2, window_bounds = array<i64: 16, 64>}, {transform_indices = @transform_3, window_bounds = array<i64: 16, 64>}, {pipeline_mode = #tpu.pipeline_mode<synchronous>, transform_indices = @transform_4, window_bounds = array<i64: 1024, 64>}, {pipeline_mode = #tpu.pipeline_mode<synchronous>, transform_indices = @transform_5, window_bounds = array<i64: 64, 32>}, {pipeline_mode = #tpu.pipeline_mode<synchronous>, transform_indices = @transform_6, window_bounds = array<i64: 1, 32>}, {transform_indices = @transform_7, window_bounds = array<i64: 16, 32>}, {transform_indices = @transform_8, window_bounds = array<i64: 16, 32>}]} {
    %c0 = arith.constant 0 : index
    %c0_0 = arith.constant 0 : index
    %0 = vector.load %arg5[%c0, %c0_0] : memref<1024x64xbf16, #tpu.memory_space<vmem>>, vector<1024x64xbf16>
    %c0_1 = arith.constant 0 : index
    %c0_2 = arith.constant 0 : index
    %1 = vector.load %arg6[%c0_1, %c0_2] : memref<64x32xbf16, #tpu.memory_space<vmem>>, vector<64x32xbf16>
    %c0_3 = arith.constant 0 : index
    %c0_4 = arith.constant 0 : index
    %2 = vector.load %arg7[%c0_3, %c0_4] : memref<1x32xf32, #tpu.memory_space<vmem>>, vector<1x32xf32>
    %c0_5 = arith.constant 0 : index
    %c0_6 = arith.constant 0 : index
    %3 = vector.load %arg1[%c0_5, %c0_6] : memref<16x1024xf32, #tpu.memory_space<vmem>>, vector<16x1024xf32>
    %4 = arith.truncf %3 : vector<16x1024xf32> to vector<16x1024xbf16>
    %cst = arith.constant dense<0.000000e+00> : vector<16x64xf32>
    %5 = tpu.matmul %4, %0, %cst {dimension_numbers = #tpu.dot_dimension_numbers<[1], [0], [0], [1], [0, 0, 1, 1], [], []>} : vector<16x1024xbf16>, vector<1024x64xbf16>, vector<16x64xf32> -> vector<16x64xf32>
    %c0_7 = arith.constant 0 : index
    %c0_8 = arith.constant 0 : index
    %6 = vector.load %arg3[%c0_7, %c0_8] : memref<16x64xf32, #tpu.memory_space<vmem>>, vector<16x64xf32>
    %7 = arith.addf %5, %6 : vector<16x64xf32>
    %cst_9 = arith.constant 0.000000e+00 : f32
    %8 = vector.broadcast %cst_9 : f32 to vector<16x64xf32>
    %9 = arith.maximumf %7, %8 : vector<16x64xf32>
    %10 = arith.truncf %9 : vector<16x64xf32> to vector<16x64xbf16>
    %cst_10 = arith.constant dense<0.000000e+00> : vector<16x32xf32>
    %11 = tpu.matmul %10, %1, %cst_10 {dimension_numbers = #tpu.dot_dimension_numbers<[1], [0], [0], [1], [0, 0, 1, 1], [], []>} : vector<16x64xbf16>, vector<64x32xbf16>, vector<16x32xf32> -> vector<16x32xf32>
    %12 = vector.broadcast %2 : vector<1x32xf32> to vector<16x32xf32>
    %13 = arith.addf %11, %12 : vector<16x32xf32>
    %14 = arith.mulf %13, %13 : vector<16x32xf32>
    %cst_11 = arith.constant dense<0.000000e+00> : vector<16xf32>
    %15 = vector.multi_reduction <add>, %14, %cst_11 [1] : vector<16x32xf32> to vector<16xf32>
    %16 = vector.shape_cast %15 : vector<16xf32> to vector<16x1xf32>
    %cst_12 = arith.constant 1.000000e-24 : f32
    %17 = vector.broadcast %cst_12 : f32 to vector<16x1xf32>
    %18 = arith.maximumf %16, %17 : vector<16x1xf32>
    %19 = math.rsqrt %18 : vector<16x1xf32>
    %20 = vector.broadcast %19 : vector<16x1xf32> to vector<16x32xf32>
    %21 = arith.mulf %13, %20 : vector<16x32xf32>
    %c0_13 = arith.constant 0 : index
    %c0_14 = arith.constant 0 : index
    %22 = vector.load %arg8[%c0_13, %c0_14] : memref<16x32xf32, #tpu.memory_space<vmem>>, vector<16x32xf32>
    tpu.vector_store %arg8[%c0_13, %c0_14], %21 {strides = array<i32>} : memref<16x32xf32, #tpu.memory_space<vmem>>, vector<16x32xf32>,
    %c0_15 = arith.constant 0 : index
    %c0_16 = arith.constant 0 : index
    %23 = vector.load %arg2[%c0_15, %c0_16] : memref<16x1024xf32, #tpu.memory_space<vmem>>, vector<16x1024xf32>
    %24 = arith.truncf %23 : vector<16x1024xf32> to vector<16x1024xbf16>
    %cst_17 = arith.constant dense<0.000000e+00> : vector<16x64xf32>
    %25 = tpu.matmul %24, %0, %cst_17 {dimension_numbers = #tpu.dot_dimension_numbers<[1], [0], [0], [1], [0, 0, 1, 1], [], []>} : vector<16x1024xbf16>, vector<1024x64xbf16>, vector<16x64xf32> -> vector<16x64xf32>
    %c0_18 = arith.constant 0 : index
    %c0_19 = arith.constant 0 : index
    %26 = vector.load %arg4[%c0_18, %c0_19] : memref<16x64xf32, #tpu.memory_space<vmem>>, vector<16x64xf32>
    %27 = arith.addf %25, %26 : vector<16x64xf32>
    %cst_20 = arith.constant 0.000000e+00 : f32
    %28 = vector.broadcast %cst_20 : f32 to vector<16x64xf32>
    %29 = arith.maximumf %27, %28 : vector<16x64xf32>
    %30 = arith.truncf %29 : vector<16x64xf32> to vector<16x64xbf16>
    %cst_21 = arith.constant dense<0.000000e+00> : vector<16x32xf32>
    %31 = tpu.matmul %30, %1, %cst_21 {dimension_numbers = #tpu.dot_dimension_numbers<[1], [0], [0], [1], [0, 0, 1, 1], [], []>} : vector<16x64xbf16>, vector<64x32xbf16>, vector<16x32xf32> -> vector<16x32xf32>
    %32 = vector.broadcast %2 : vector<1x32xf32> to vector<16x32xf32>
    %33 = arith.addf %31, %32 : vector<16x32xf32>
    %34 = arith.mulf %33, %33 : vector<16x32xf32>
    %cst_22 = arith.constant dense<0.000000e+00> : vector<16xf32>
    %35 = vector.multi_reduction <add>, %34, %cst_22 [1] : vector<16x32xf32> to vector<16xf32>
    %36 = vector.shape_cast %35 : vector<16xf32> to vector<16x1xf32>
    %cst_23 = arith.constant 1.000000e-24 : f32
    %37 = vector.broadcast %cst_23 : f32 to vector<16x1xf32>
    %38 = arith.maximumf %36, %37 : vector<16x1xf32>
    %39 = math.rsqrt %38 : vector<16x1xf32>
    %40 = vector.broadcast %39 : vector<16x1xf32> to vector<16x32xf32>
    %41 = arith.mulf %33, %40 : vector<16x32xf32>
    %c0_24 = arith.constant 0 : index
    %c0_25 = arith.constant 0 : index
    %42 = vector.load %arg9[%c0_24, %c0_25] : memref<16x32xf32, #tpu.memory_space<vmem>>, vector<16x32xf32>
    tpu.vector_store %arg9[%c0_24, %c0_25], %41 {strides = array<i32>} : memref<16x32xf32, #tpu.memory_space<vmem>>, vector<16x32xf32>,
    return
  }
  func.func @transform_0(%arg0: i32) -> (i32, i32) {
    %c0_i32 = arith.constant 0 : i32
    %c0_i32_0 = arith.constant 0 : i32
    return %arg0, %c0_i32 : i32, i32
  }
  func.func @transform_1(%arg0: i32) -> (i32, i32) {
    %c0_i32 = arith.constant 0 : i32
    %c0_i32_0 = arith.constant 0 : i32
    return %arg0, %c0_i32 : i32, i32
  }
  func.func @transform_2(%arg0: i32) -> (i32, i32) {
    %c0_i32 = arith.constant 0 : i32
    %c0_i32_0 = arith.constant 0 : i32
    return %arg0, %c0_i32 : i32, i32
  }
  func.func @transform_3(%arg0: i32) -> (i32, i32) {
    %c0_i32 = arith.constant 0 : i32
    %c0_i32_0 = arith.constant 0 : i32
    return %arg0, %c0_i32 : i32, i32
  }
  func.func @transform_4(%arg0: i32) -> (i32, i32) {
    %c0_i32 = arith.constant 0 : i32
    %c0_i32_0 = arith.constant 0 : i32
    %c0_i32_1 = arith.constant 0 : i32
    return %c0_i32, %c0_i32_0 : i32, i32
  }
  func.func @transform_5(%arg0: i32) -> (i32, i32) {
    %c0_i32 = arith.constant 0 : i32
    %c0_i32_0 = arith.constant 0 : i32
    %c0_i32_1 = arith.constant 0 : i32
    return %c0_i32, %c0_i32_0 : i32, i32
  }
  func.func @transform_6(%arg0: i32) -> (i32, i32) {
    %c0_i32 = arith.constant 0 : i32
    %c0_i32_0 = arith.constant 0 : i32
    %c0_i32_1 = arith.constant 0 : i32
    return %c0_i32, %c0_i32_0 : i32, i32
  }
  func.func @transform_7(%arg0: i32) -> (i32, i32) {
    %c0_i32 = arith.constant 0 : i32
    %c0_i32_0 = arith.constant 0 : i32
    return %arg0, %c0_i32 : i32, i32
  }
  func.func @transform_8(%arg0: i32) -> (i32, i32) {
    %c0_i32 = arith.constant 0 : i32
    %c0_i32_0 = arith.constant 0 : i32
    return %arg0, %c0_i32 : i32, i32
  }
}

</mosaic_0001>

<bundles_post_ra>
// kernel: tpu_custom_call.1
= control target key start
LH: loop header
LB: loop body
LE: loop exit
PB: predicated region body
PF: predicated region fallthrough
CT: control target
= control target key end

     0   :  { %14 = vsyncpa [#allocation3], 0  ;;  %s2175_s0 = inlined_call_operand.vmem [shape: f32[16,1024], index: 0, kind: input, shape index: {}]   ;;  %s2176_s1 = inlined_call_operand.vmem [shape: f32[16,1024], index: 1, kind: input, shape index: {}]   ;;  %s2177_s2 = inlined_call_operand.vmem [shape: f32[16,64], index: 2, kind: input, shape index: {}]   ;;  %s2178_s3 = inlined_call_operand.vmem [shape: f32[16,64], index: 3, kind: input, shape index: {}]   ;;  %s2179_s4 = inlined_call_operand.vmem [shape: bf16[1024,64], index: 4, kind: input, shape index: {}]   ;;  %s2180_s5 = inlined_call_operand.vmem [shape: bf16[64,32], index: 5, kind: input, shape index: {}]   ;;  %s2181_s6 = inlined_call_operand.vmem [shape: f32[1,32], index: 6, kind: input, shape index: {}]   ;;  %s2182_s7 = inlined_call_operand.hbm [shape: f32[16,32], index: 7, kind: output, shape index: {0}]   ;;  %s2183_s8 = inlined_call_operand.hbm [shape: f32[16,32], index: 8, kind: output, shape index: {1}]  }
   0x1   :  { %v1583_v0 = vld [vmem:[%s2179_s4 + $0x78] sm:$0xff]   ;;  %v1606_v4 = vld [vmem:[%s2179_s4 + $0x70] sm:$0xff]   ;;  %v1630_v8 = vld [vmem:[%s2179_s4 + $0x68] sm:$0xff]  }
   0x2   :  { %v1588_v1 = vld [vmem:[%s2179_s4 + $0xf8] sm:$0xff]   ;;  %1193 = vmatprep.subr.bf16.mxu0 %v1583_v0  ;;  %v1612_v5 = vld [vmem:[%s2179_s4 + $0xf0] sm:$0xff]   ;;  %v1636_v9 = vld [vmem:[%s2179_s4 + $0xe8] sm:$0xff]  }
   0x3   :  { %v1594_v2 = vld [vmem:[%s2179_s4 + $0x38] sm:$0xff]   ;;  %1215 = vmatprep.subr.bf16.mxu1 %v1588_v1  ;;  %v1618_v6 = vld [vmem:[%s2179_s4 + $0x30] sm:$0xff]   ;;  %v1642_v10 = vld [vmem:[%s2179_s4 + $0x28] sm:$0xff]  }
   0x4   :  { %v1600_v3 = vld [vmem:[%s2179_s4 + $0xb8] sm:$0xff]   ;;  %1194 = vmatpush3.bf16.msra.mxu0 %v1594_v2  ;;  %v1624_v7 = vld [vmem:[%s2179_s4 + $0xb0] sm:$0xff]   ;;  %v1648_v11 = vld [vmem:[%s2179_s4 + $0xa8] sm:$0xff]  }
   0x5   :  { %1216 = vmatpush3.bf16.msra.mxu1 %v1600_v3  ;;  %1195 = vmatprep.subr.bf16.mxu0 %v1606_v4  ;;  %v1654_v12 = vld [vmem:[%s2179_s4 + $0x60] sm:$0xff]   ;;  %v1678_v16 = vld [vmem:[%s2179_s4 + $0x58] sm:$0xff]   ;;  %v1702_v20 = vld [vmem:[%s2179_s4 + $0x50] sm:$0xff]  }
   0x6   :  { %1217 = vmatprep.subr.bf16.mxu1 %v1612_v5  ;;  %v1660_v13 = vld [vmem:[%s2179_s4 + $0xe0] sm:$0xff]   ;;  %v1684_v17 = vld [vmem:[%s2179_s4 + $0xd8] sm:$0xff]   ;;  %v1708_v21 = vld [vmem:[%s2179_s4 + $0xd0] sm:$0xff]  }
   0x7   :  { %v1666_v14 = vld [vmem:[%s2179_s4 + $0x20] sm:$0xff]   ;;  %v1690_v18 = vld [vmem:[%s2179_s4 + $0x18] sm:$0xff]   ;;  %v1714_v22 = vld [vmem:[%s2179_s4 + $0x10] sm:$0xff]  }
   0x8   :  { %1196 = vmatpush3.bf16.msra.mxu0 %v1618_v6  ;;  %v1672_v15 = vld [vmem:[%s2179_s4 + $0xa0] sm:$0xff]   ;;  %v1696_v19 = vld [vmem:[%s2179_s4 + $0x98] sm:$0xff]   ;;  %v1720_v23 = vld [vmem:[%s2179_s4 + $0x90] sm:$0xff]  }
   0x9   :  { %1218 = vmatpush3.bf16.msra.mxu1 %v1624_v7  ;;  %1197 = vmatprep.subr.bf16.mxu0 %v1630_v8  ;;  %v1726_v24 = vld [vmem:[%s2179_s4 + $0x48] sm:$0xff]   ;;  %v1750_v28 = vld [vmem:[%s2179_s4 + $0x40] sm:$0xff]   ;;  %v171_v34 = vld [vmem:[%s2175_s0 + $0x18] sm:$0xff] }
   0xa   :  { %1219 = vmatprep.subr.bf16.mxu1 %v1636_v9  ;;  %v1732_v25 = vld [vmem:[%s2179_s4 + $0xc8] sm:$0xff]   ;;  %v1756_v29 = vld [vmem:[%s2179_s4 + $0xc0] sm:$0xff]   ;;  %v179_v36 = vld [vmem:[%s2175_s0 + $0x58] sm:$0xff] }
   0xb   :  { %v1738_v26 = vld [vmem:[%s2179_s4 + $0x8] sm:$0xff]   ;;  %v1762_v30 = vld [vmem:[%s2179_s4] sm:$0xff]   ;;  %v187_v39 = vpack.c.bf16 %v179_v36, %v171_v34  ;;  %v170_v41 = vld [vmem:[%s2175_s0 + $0x10] sm:$0xff] }
   0xc   :  { %1198 = vmatpush3.bf16.msra.mxu0 %v1642_v10  ;;  %v1744_v27 = vld [vmem:[%s2179_s4 + $0x88] sm:$0xff]   ;;  %v1768_v31 = vld [vmem:[%s2179_s4 + $0x80] sm:$0xff]   ;;  %v178_v42 = vld [vmem:[%s2175_s0 + $0x50] sm:$0xff] }
   0xd   :  { %1220 = vmatpush3.bf16.msra.mxu1 %v1648_v11  ;;  %1199 = vmatprep.subr.bf16.mxu0 %v1654_v12  ;;  %v169_v32 = vld [vmem:[%s2175_s0 + $0x8] sm:$0xff]  ;;  %v168_v37 = vld [vmem:[%s2175_s0] sm:$0xff]  ;;  %v186_v43 = vpack.c.bf16 %v178_v42, %v170_v41  ;;  %v1799_v44 = vld [vmem:[%s2179_s4 + $0x178] sm:$0xff]  }
   0xe   :  { %1221 = vmatprep.subr.bf16.mxu1 %v1660_v13  ;;  %v177_v33 = vld [vmem:[%s2175_s0 + $0x48] sm:$0xff]  ;;  %v176_v38 = vld [vmem:[%s2175_s0 + $0x40] sm:$0xff]  ;;  %651 = vmatprep.mubr.bf16.mxu1 %v187_v39  ;;  %v1804_v45 = vld [vmem:[%s2179_s4 + $0x1f8] sm:$0xff]  }
   0xf   :  { %v185_v35 = vpack.c.bf16 %v177_v33, %v169_v32  ;;  %v184_v40 = vpack.c.bf16 %v176_v38, %v168_v37  ;;  %v1810_v46 = vld [vmem:[%s2179_s4 + $0x138] sm:$0xff]   ;;  %v1822_v48 = vld [vmem:[%s2179_s4 + $0x170] sm:$0xff]   ;;  %v1846_v52 = vld [vmem:[%s2179_s4 + $0x168] sm:$0xff]  }
  0x10   :  { %1200 = vmatpush3.bf16.msra.mxu0 %v1666_v14  ;;  %v1816_v47 = vld [vmem:[%s2179_s4 + $0x1b8] sm:$0xff]   ;;  %v1828_v49 = vld [vmem:[%s2179_s4 + $0x1f0] sm:$0xff]   ;;  %v1852_v53 = vld [vmem:[%s2179_s4 + $0x1e8] sm:$0xff]  }
  0x11   :  { %1222 = vmatpush3.bf16.msra.mxu1 %v1672_v15  ;;  %1201 = vmatprep.subr.bf16.mxu0 %v1678_v16  ;;  %v1834_v50 = vld [vmem:[%s2179_s4 + $0x130] sm:$0xff]   ;;  %2195 = vst [vmem:[#allocation8_spill] sm:$0xff] %v1852_v53  ;;  %v1858_v54 = vld [vmem:[%s2179_s4 + $0x128] sm:$0xff]   ;;  %v1870_v56 = vld [vmem:[%s2179_s4 + $0x160] sm:$0xff]  }
  0x12   :  { %1223 = vmatprep.subr.bf16.mxu1 %v1684_v17  ;;  %610 = vmatprep.mubr.bf16.mxu0 %v185_v35  ;;  %v1840_v51 = vld [vmem:[%s2179_s4 + $0x1b0] sm:$0xff]   ;;  %v1864_v55 = vld [vmem:[%s2179_s4 + $0x1a8] sm:$0xff]   ;;  %v1876_v57 = vld [vmem:[%s2179_s4 + $0x1e0] sm:$0xff]  }
  0x13   :  { %2196 = vst [vmem:[#allocation9_spill] sm:$0xff] %v1864_v55  ;;  %2197 = vst [vmem:[#allocation10_spill] sm:$0xff] %v1876_v57  ;;  %v1882_v58 = vld [vmem:[%s2179_s4 + $0x120] sm:$0xff]   ;;  %v1894_v60 = vld [vmem:[%s2179_s4 + $0x158] sm:$0xff]  }
  0x14   :  { %1202 = vmatpush3.bf16.msra.mxu0 %v1690_v18  ;;  %v1888_v59 = vld [vmem:[%s2179_s4 + $0x1a0] sm:$0xff]   ;;  %v1900_v61 = vld [vmem:[%s2179_s4 + $0x1d8] sm:$0xff]   ;;  %v1918_v32 = vld [vmem:[%s2179_s4 + $0x150] sm:$0xff]  }
  0x15   :  { %1224 = vmatpush3.bf16.msra.mxu1 %v1696_v19  ;;  %1203 = vmatprep.subr.bf16.mxu0 %v1702_v20  ;;  %2198 = vst [vmem:[#allocation11_spill] sm:$0xff] %v1888_v59  ;;  %2199 = vst [vmem:[#allocation12_spill] sm:$0xff] %v1900_v61  ;;  %v1906_v62 = vld [vmem:[%s2179_s4 + $0x118] sm:$0xff]   ;;  %v1924_v33 = vld [vmem:[%s2179_s4 + $0x1d0] sm:$0xff]  }
  0x16   :  { %1225 = vmatprep.subr.bf16.mxu1 %v1708_v21  ;;  %v1912_v63 = vld [vmem:[%s2179_s4 + $0x198] sm:$0xff]   ;;  %2201 = vst [vmem:[#allocation14_spill] sm:$0xff] %v1924_v33  ;;  %v1930_v34 = vld [vmem:[%s2179_s4 + $0x110] sm:$0xff]   ;;  %v1942_v36 = vld [vmem:[%s2179_s4 + $0x148] sm:$0xff]  }
  0x17   :  { %2200 = vst [vmem:[#allocation13_spill] sm:$0xff] %v1912_v63  ;;  %v1936_v35 = vld [vmem:[%s2179_s4 + $0x190] sm:$0xff]   ;;  %v1948_v37 = vld [vmem:[%s2179_s4 + $0x1c8] sm:$0xff]   ;;  %v1972_v41 = vld [vmem:[%s2179_s4 + $0x1c0] sm:$0xff]  }
  0x18   :  { %1204 = vmatpush3.bf16.msra.mxu0 %v1714_v22  ;;  %2202 = vst [vmem:[#allocation15_spill] sm:$0xff] %v1936_v35  ;;  %2203 = vst [vmem:[#allocation16_spill] sm:$0xff] %v1948_v37  ;;  %v1954_v38 = vld [vmem:[%s2179_s4 + $0x108] sm:$0xff]   ;;  %v1978_v42 = vld [vmem:[%s2179_s4 + $0x100] sm:$0xff]  }
  0x19   :  { %1226 = vmatpush3.bf16.msra.mxu1 %v1720_v23  ;;  %1205 = vmatprep.subr.bf16.mxu0 %v1726_v24  ;;  %v1960_v39 = vld [vmem:[%s2179_s4 + $0x188] sm:$0xff]   ;;  %2205 = vst [vmem:[#allocation18_spill] sm:$0xff] %v1972_v41 }
  0x1a   :  { %1227 = vmatprep.subr.bf16.mxu1 %v1732_v25  ;;  %2204 = vst [vmem:[#allocation17_spill] sm:$0xff] %v1960_v39 }
  0x1c   :  { %1206 = vmatpush3.bf16.msra.mxu0 %v1738_v26 }
  0x1d   :  { %1228 = vmatpush3.bf16.msra.mxu1 %v1744_v27  ;;  %1207 = vmatprep.subr.bf16.mxu0 %v1750_v28 }
  0x1e   :  { %1229 = vmatprep.subr.bf16.mxu1 %v1756_v29 }
  0x20   :  { %1208 = vmatpush3.bf16.msra.mxu0 %v1762_v30 }
  0x21   :  { %1230 = vmatpush3.bf16.msra.mxu1 %v1768_v31  ;;  %1237 = vmatprep.subr.bf16.mxu0 %v1799_v44 }
  0x22   :  { %1259 = vmatprep.subr.bf16.mxu1 %v1804_v45 }
  0x23   :  { %611 = vmatmul.mubr.bf16.vlgmr.msra.gmra.mxu0 %v184_v40  ;;  %v1966_v40 = vld [vmem:[%s2179_s4 + $0x140] sm:$0xff]  }
  0x24   :  { %652 = vmatmul.mubr.bf16.vlgmr.msra.gmra.mxu1 %v186_v43  ;;  %1238 = vmatpush3.bf16.msra.mxu0 %v1810_v46  ;;  %v1984_v43 = vld [vmem:[%s2179_s4 + $0x180] sm:$0xff]  }
  0x25   :  { %1260 = vmatpush3.bf16.msra.mxu1 %v1816_v47  ;;  %1239 = vmatprep.subr.bf16.mxu0 %v1822_v48 }
  0x26   :  { %1261 = vmatprep.subr.bf16.mxu1 %v1828_v49 }
  0x28   :  { %1240 = vmatpush3.bf16.msra.mxu0 %v1834_v50 }
  0x29   :  { %1262 = vmatpush3.bf16.msra.mxu1 %v1840_v51  ;;  %1241 = vmatprep.subr.bf16.mxu0 %v1846_v52 }
  0x2a   :  { %1263 = vmatprep.subr.bf16.mxu1 %v1852_v53  ;;  %v182_v53 = vld [vmem:[%s2175_s0 + $0x70] sm:$0xff] }
  0x2c   :  { %1242 = vmatpush3.bf16.msra.mxu0 %v1858_v54 }
  0x2d   :  { %1264 = vmatpush3.bf16.msra.mxu1 %v1864_v55  ;;  %1243 = vmatprep.subr.bf16.mxu0 %v1870_v56 }
  0x2e   :  { %1265 = vmatprep.subr.bf16.mxu1 %v1876_v57  ;;  %v174_v57 = vld [vmem:[%s2175_s0 + $0x30] sm:$0xff] }
  0x30   :  { %1244 = vmatpush3.bf16.msra.mxu0 %v1882_v58 }
  0x31   :  { %1266 = vmatpush3.bf16.msra.mxu1 %v1888_v59  ;;  %1245 = vmatprep.subr.bf16.mxu0 %v1894_v60  ;;  %v180_v59 = vld [vmem:[%s2175_s0 + $0x60] sm:$0xff] }
  0x32   :  { %1267 = vmatprep.subr.bf16.mxu1 %v1900_v61  ;;  %v172_v61 = vld [vmem:[%s2175_s0 + $0x20] sm:$0xff] }
  0x33   :  { %v188_v55 = vpack.c.bf16 %v180_v59, %v172_v61 }
  0x34   :  { %1246 = vmatpush3.bf16.msra.mxu0 %v1906_v62 }
  0x35   :  { %1268 = vmatpush3.bf16.msra.mxu1 %v1912_v63  ;;  %1247 = vmatprep.subr.bf16.mxu0 %v1918_v32 }
  0x36   :  { %1269 = vmatprep.subr.bf16.mxu1 %v1924_v33 }
  0x38   :  { %1248 = vmatpush3.bf16.msra.mxu0 %v1930_v34 }
  0x39   :  { %1270 = vmatpush3.bf16.msra.mxu1 %v1936_v35  ;;  %1249 = vmatprep.subr.bf16.mxu0 %v1942_v36  ;;  %v175_v35 = vld [vmem:[%s2175_s0 + $0x38] sm:$0xff] }
  0x3a   :  { %1271 = vmatprep.subr.bf16.mxu1 %v1948_v37  ;;  %v181_v37 = vld [vmem:[%s2175_s0 + $0x68] sm:$0xff] }
  0x3c   :  { %1250 = vmatpush3.bf16.msra.mxu0 %v1954_v38 }
  0x3d   :  { %1272 = vmatpush3.bf16.msra.mxu1 %v1960_v39  ;;  %1251 = vmatprep.subr.bf16.mxu0 %v1966_v40  ;;  %v173_v39 = vld [vmem:[%s2175_s0 + $0x28] sm:$0xff] }
  0x3e   :  { %1273 = vmatprep.subr.bf16.mxu1 %v1972_v41  ;;  %v183_v41 = vld [vmem:[%s2175_s0 + $0x78] sm:$0xff]  ;;  %v189_v33 = vpack.c.bf16 %v181_v37, %v173_v39 }
  0x3f   :  { %v191_v63 = vpack.c.bf16 %v183_v41, %v175_v35  ;;  %v190_v35 = vpack.c.bf16 %v182_v53, %v174_v57 }
  0x40   :  { %1252 = vmatpush3.bf16.msra.mxu0 %v1978_v42  ;;  %692 = vmatprep.mubr.bf16.mxu0 %v189_v33 }
  0x41   :  { %1274 = vmatpush3.bf16.msra.mxu1 %v1984_v43  ;;  %733 = vmatprep.mubr.bf16.mxu1 %v191_v63 }
  0x42   :  { %1286 = vmatprep.subr.bf16.mxu1 %v1583_v0 }
  0x43   :  { %693 = vmatmul.mubr.bf16.vlgmr.msra.gmra.mxu0 %v188_v55 }
  0x44   :  { %734 = vmatmul.mubr.bf16.vlgmr.msra.gmra.mxu1 %v190_v35 }
  0x45   :  { %15 = vsyncpa [#allocation5], 0  ;;  %1287 = vmatpush3.bf16.msra.mxu1 %v1594_v2  ;;  %v1473_v0 = vld [vmem:[%s2180_s5 + $0x18] sm:$0xff]   ;;  %v1529_v2 = vmov 0.0   ;;  %vm1530_vm0 = vmmov 0   ;;  %v192_v55 = vld [vmem:[%s2177_s2] sm:$0xff] }
  0x46   :  { %1288 = vmatprep.subr.bf16.mxu1 %v1606_v4  ;;  %1379 = vmatprep.subr.bf16.mxu0 %v1529_v2  ;;  %v1474_v4 = vld [vmem:[%s2180_s5 + $0x10] sm:$0xff]   ;;  %v193_v61 = vld [vmem:[%s2177_s2 + $0x8] sm:$0xff]  ;;  %vm775_vm1 = vcmask 523264   ;;  %vm822_vm2 = vcmask 261120  }
  0x47   :  { %1380 = vmatpush3.bf16.msra.mxu0 %v1473_v0  ;;  %1387 = vmatprep.mubr.msk.bf16.mxu0 %vm1530_vm0, %v1529_v2 }
  0x48   :  { %1381 = vmatprep.subr.bf16.mxu0 %v1529_v2 }
  0x49   :  { %1289 = vmatpush3.bf16.msra.mxu1 %v1618_v6  ;;  %v1475_v6 = vld [vmem:[%s2180_s5 + $0x8] sm:$0xff]  }
  0x4a   :  { %1290 = vmatprep.subr.bf16.mxu1 %v1630_v8  ;;  %v1476_v8 = vld [vmem:[%s2180_s5] sm:$0xff]  }
  0x4b   :  { %1382 = vmatpush3.bf16.msra.mxu0 %v1474_v4 }
  0x4c   :  { %1383 = vmatprep.subr.bf16.mxu0 %v1529_v2 }
  0x4d   :  { %1291 = vmatpush3.bf16.msra.mxu1 %v1642_v10  ;;  %v838_v10 = vld [vmem:[%s2176_s1 + $0x8] sm:$0xff] }
  0x4e   :  { %1292 = vmatprep.subr.bf16.mxu1 %v1654_v12  ;;  %v846_v12 = vld [vmem:[%s2176_s1 + $0x48] sm:$0xff] }
  0x4f   :  { %1384 = vmatpush3.bf16.msra.mxu0 %v1475_v6 }
  0x50   :  { %1385 = vmatprep.subr.bf16.mxu0 %v1529_v2 }
  0x51   :  { %1293 = vmatpush3.bf16.msra.mxu1 %v1666_v14  ;;  %v854_v14 = vpack.c.bf16 %v846_v12, %v838_v10 }
  0x52   :  { %1294 = vmatprep.subr.bf16.mxu1 %v1678_v16  ;;  %v837_v16 = vld [vmem:[%s2176_s1] sm:$0xff] }
  0x53   :  { %1386 = vmatpush3.bf16.msra.mxu0 %v1476_v8  ;;  %895 = vmatprep.mubr.bf16.mxu1 %v854_v14  ;;  %v840_v14 = vld [vmem:[%s2176_s1 + $0x18] sm:$0xff] }
  0x54   :  { %1308 = vmatprep.subr.bf16.mxu0 %v1588_v1  ;;  %v845_v1 = vld [vmem:[%s2176_s1 + $0x40] sm:$0xff] }
  0x55   :  { %1295 = vmatpush3.bf16.msra.mxu1 %v1690_v18  ;;  %v853_v18 = vpack.c.bf16 %v845_v1, %v837_v16  ;;  %v848_v16 = vld [vmem:[%s2176_s1 + $0x58] sm:$0xff] }
  0x56   :  { %1296 = vmatprep.subr.bf16.mxu1 %v1702_v20  ;;  %v842_v20 = vld [vmem:[%s2176_s1 + $0x28] sm:$0xff] }
  0x59   :  { %1297 = vmatpush3.bf16.msra.mxu1 %v1714_v22  ;;  %v850_v22 = vld [vmem:[%s2176_s1 + $0x68] sm:$0xff] }
  0x5a   :  { %1298 = vmatprep.subr.bf16.mxu1 %v1726_v24  ;;  %v858_v24 = vpack.c.bf16 %v850_v22, %v842_v20  ;;  %v856_v20 = vpack.c.bf16 %v848_v16, %v840_v14 }
  0x5d   :  { %1299 = vmatpush3.bf16.msra.mxu1 %v1738_v26  ;;  %v841_v26 = vld [vmem:[%s2176_s1 + $0x20] sm:$0xff] }
  0x5e   :  { %1300 = vmatprep.subr.bf16.mxu1 %v1750_v28  ;;  %v849_v28 = vld [vmem:[%s2176_s1 + $0x60] sm:$0xff] }
  0x61   :  { %1301 = vmatpush3.bf16.msra.mxu1 %v1762_v30  ;;  %v857_v30 = vpack.c.bf16 %v849_v28, %v841_v26  ;;  %v2148_v26 = vld [vmem:[%s2181_s6] ss:$0 sm:$0xff] }
  0x62   :  { %1330 = vmatprep.subr.bf16.mxu1 %v1799_v44 }
  0x64   :  { %896 = vmatmul.mubr.bf16.vlgmr.msra.gmra.mxu1 %v853_v18 }
  0x65   :  { %1331 = vmatpush3.bf16.msra.mxu1 %v1810_v46  ;;  %977 = vmatprep.mubr.bf16.mxu1 %v858_v24 }
  0x66   :  { %1332 = vmatprep.subr.bf16.mxu1 %v1822_v48 }
  0x69   :  { %1333 = vmatpush3.bf16.msra.mxu1 %v1834_v50 }
  0x6a   :  { %1334 = vmatprep.subr.bf16.mxu1 %v1846_v52 }
  0x6d   :  { %1335 = vmatpush3.bf16.msra.mxu1 %v1858_v54 }
  0x6e   :  { %1336 = vmatprep.subr.bf16.mxu1 %v1870_v56 }
  0x71   :  { %1337 = vmatpush3.bf16.msra.mxu1 %v1882_v58 }
  0x72   :  { %1338 = vmatprep.subr.bf16.mxu1 %v1894_v60 }
  0x75   :  { %1339 = vmatpush3.bf16.msra.mxu1 %v1906_v62 }
  0x76   :  { %1340 = vmatprep.subr.bf16.mxu1 %v1918_v32 }
  0x79   :  { %1341 = vmatpush3.bf16.msra.mxu1 %v1930_v34 }
  0x7a   :  { %1342 = vmatprep.subr.bf16.mxu1 %v1942_v36 }
  0x7d   :  { %1343 = vmatpush3.bf16.msra.mxu1 %v1954_v38 }
  0x7e   :  { %1344 = vmatprep.subr.bf16.mxu1 %v1966_v40 }
  0x81   :  { %1345 = vmatpush3.bf16.msra.mxu1 %v1978_v42 }
  0x82   :  { %1391 = vmatprep.subr.bf16.mxu1 %v1529_v2 }
  0x84   :  { %978 = vmatmul.mubr.bf16.vlgmr.msra.gmra.mxu1 %v857_v30 }
  0x85   :  { %1392 = vmatpush3.bf16.msra.mxu1 %v1473_v0  ;;  %1399 = vmatprep.mubr.msk.bf16.mxu1 %vm1530_vm0, %v1529_v2 }
  0x86   :  { %1393 = vmatprep.subr.bf16.mxu1 %v1529_v2 }
  0x89   :  { %1394 = vmatpush3.bf16.msra.mxu1 %v1474_v4 }
  0x8a   :  { %1395 = vmatprep.subr.bf16.mxu1 %v1529_v2 }
  0x8d   :  { %1396 = vmatpush3.bf16.msra.mxu1 %v1475_v6 }
  0x8e   :  { %1397 = vmatprep.subr.bf16.mxu1 %v1529_v2 }
  0x91   :  { %1398 = vmatpush3.bf16.msra.mxu1 %v1476_v8 }
  0xe3   :  { %v1209_v44 = vpop.f32.mrf.mxu0 }
  0xe4   :  { %v1231_v46 = vpop.f32.mrf.mxu1 }
  0xe5   :  { %v1210_v48 = vpop.f32.mrf.mxu0 }
  0xe6   :  { %v1232_v50 = vpop.f32.mrf.mxu1  ;;  %v1211_v53 = vadd.f32 %v1210_v48, %v1209_v44 }
  0xe7   :  { %v1212_v52 = vpop.f32.mrf.mxu0  ;;  %v1233_v58 = vadd.f32 %v1232_v50, %v1231_v46 }
  0xe8   :  { %v1234_v54 = vpop.f32.mrf.mxu1  ;;  %v613_v57 = vadd.f32 %v1211_v53, %v192_v55 }
  0xe9   :  { %v1213_v56 = vpop.f32.mrf.mxu0 }
  0xea   :  { %v1214_v59 = vadd.f32 %v1213_v56, %v1212_v52  ;;  %v1235_v60 = vpop.f32.mrf.mxu1  ;;  %v654_v33 = vadd.f32 %v1233_v58, %v613_v57 }
  0xeb   :  { %v1236_v39 = vadd.f32 %v1235_v60, %v1234_v54 }
  0xec   :  { %v616_v34 = vadd.f32 %v1214_v59, %v193_v61 }
  0xee   :  { %v657_v35 = vadd.f32 %v1236_v39, %v616_v34 }
 0x103   :  { %v1253_v62 = vpop.f32.mrf.mxu0 }
 0x104   :  { %v1275_v63 = vpop.f32.mrf.mxu1 }
 0x105   :  { %v1254_v32 = vpop.f32.mrf.mxu0 }
 0x106   :  { %v1255_v36 = vadd.f32 %v1254_v32, %v1253_v62  ;;  %v1276_v37 = vpop.f32.mrf.mxu1 }
 0x107   :  { %v1256_v38 = vpop.f32.mrf.mxu0  ;;  %v1277_v0 = vadd.f32 %v1276_v37, %v1275_v63 }
 0x108   :  { %v695_v40 = vadd.f32 %v1255_v36, %v654_v33  ;;  %v1278_v41 = vpop.f32.mrf.mxu1  ;;  %v861_v33 = vld [vmem:[%s2178_s3] sm:$0xff] }
 0x109   :  { %v1257_v42 = vpop.f32.mrf.mxu0 }
 0x10a   :  { %v1258_v2 = vadd.f32 %v1257_v42, %v1256_v38  ;;  %v1279_v4 = vpop.f32.mrf.mxu1  ;;  %v736_v6 = vadd.f32 %v1277_v0, %v695_v40  ;;  %v862_v40 = vld [vmem:[%s2178_s3 + $0x8] sm:$0xff]  ;;  %s1531_s3 = smov [#allocation2]  }
 0x10b   :  { %v1280_v10 = vadd.f32 %v1279_v4, %v1278_v41  ;;  %s1095_s29 = sshll.u32 %s1531_s3, 4  ;;  %s1096_s29 = int_to_ptr.vmem [resolvable:$true] %s1095_s29 }
 0x10c   :  { %v698_v8 = vadd.f32 %v1258_v2, %v657_v35  ;;  %v742_v1 = vmax.f32 %v736_v6, 0.0  ;;  %s1485_s30 = scalar_lea.vmem %s1096_s29, 256  ;;  %p1490_p1 = scmp.lt.s32.totalorder %s1096_s29, %s1096_s29 }
 0x10d   :  { %p1486_p0 = scmp.ne.s32.totalorder %s1096_s29, %s1485_s30  ;;  %p1491_p2 = scmp.lt.s32.totalorder %s1485_s30, %s1485_s30 }
 0x10e   :  { %v739_v12 = vadd.f32 %v1280_v10, %v698_v8 }
 0x10f   :  { %p1492_p3 = por %p1491_p2, %p1490_p1 }
 0x110   :  { %v743_v18 = vmax.f32 %v739_v12, 0.0 }
 0x111   :  { %p1493_p4 = pnand %p1492_p3, %p1486_p0 }
 0x112   :  { %v744_v22 = vpack.c.bf16 %v743_v18, %v742_v1 }
 0x114   :  { %1388 = vmatmul.mubr.msk.bf16.vlgmr.msra.gmra.mxu0 %vm775_vm1, %v744_v22 }
 0x115   :  { %1309 = vmatpush3.bf16.msra.mxu0 %v1600_v3  ;;  %936 = vmatprep.mubr.bf16.mxu0 %v856_v20  ;;  %v839_v3 = vld [vmem:[%s2176_s1 + $0x10] sm:$0xff] }
 0x116   :  { %1310 = vmatprep.subr.bf16.mxu0 %v1612_v5  ;;  %v847_v5 = vld [vmem:[%s2176_s1 + $0x50] sm:$0xff] }
 0x119   :  { %1311 = vmatpush3.bf16.msra.mxu0 %v1624_v7  ;;  %v844_v7 = vld [vmem:[%s2176_s1 + $0x38] sm:$0xff] }
 0x11a   :  { %1312 = vmatprep.subr.bf16.mxu0 %v1636_v9  ;;  %v852_v9 = vld [vmem:[%s2176_s1 + $0x78] sm:$0xff] }
 0x11d   :  { %1313 = vmatpush3.bf16.msra.mxu0 %v1648_v11  ;;  %v855_v11 = vpack.c.bf16 %v847_v5, %v839_v3 }
 0x11e   :  { %1314 = vmatprep.subr.bf16.mxu0 %v1660_v13  ;;  %v860_v13 = vpack.c.bf16 %v852_v9, %v844_v7 }
 0x121   :  { %1315 = vmatpush3.bf16.msra.mxu0 %v1672_v15  ;;  %v2206_v15 = vld [vmem:[#allocation8_spill] sm:$0xff] }
 0x122   :  { %1316 = vmatprep.subr.bf16.mxu0 %v1684_v17  ;;  %v2207_v17 = vld [vmem:[#allocation9_spill] sm:$0xff] }
 0x124   :  { %v1302_v55 = vpop.f32.mrf.mxu1 }
 0x125   :  { %1317 = vmatpush3.bf16.msra.mxu0 %v1696_v19  ;;  %v2208_v19 = vld [vmem:[#allocation10_spill] sm:$0xff] }
 0x126   :  { %1318 = vmatprep.subr.bf16.mxu0 %v1708_v21  ;;  %v2209_v21 = vld [vmem:[#allocation11_spill] sm:$0xff]  ;;  %v1303_v56 = vpop.f32.mrf.mxu1 }
 0x127   :  { %v1304_v32 = vadd.f32 %v1303_v56, %v1302_v55 }
 0x128   :  { %v1305_v57 = vpop.f32.mrf.mxu1 }
 0x129   :  { %1319 = vmatpush3.bf16.msra.mxu0 %v1720_v23  ;;  %v2210_v23 = vld [vmem:[#allocation12_spill] sm:$0xff]  ;;  %v898_v37 = vadd.f32 %v1304_v32, %v861_v33 }
 0x12a   :  { %1320 = vmatprep.subr.bf16.mxu0 %v1732_v25  ;;  %v2211_v25 = vld [vmem:[#allocation13_spill] sm:$0xff]  ;;  %v1306_v58 = vpop.f32.mrf.mxu1 }
 0x12b   :  { %v1307_v38 = vadd.f32 %v1306_v58, %v1305_v57 }
 0x12d   :  { %1321 = vmatpush3.bf16.msra.mxu0 %v1744_v27  ;;  %v2212_v27 = vld [vmem:[#allocation14_spill] sm:$0xff]  ;;  %v901_v0 = vadd.f32 %v1307_v38, %v862_v40 }
 0x12e   :  { %1322 = vmatprep.subr.bf16.mxu0 %v1756_v29  ;;  %v2213_v29 = vld [vmem:[#allocation15_spill] sm:$0xff] }
 0x131   :  { %1323 = vmatpush3.bf16.msra.mxu0 %v1768_v31  ;;  %v2214_v31 = vld [vmem:[#allocation16_spill] sm:$0xff] }
 0x132   :  { %1352 = vmatprep.subr.bf16.mxu0 %v1804_v45  ;;  %v2215_v45 = vld [vmem:[#allocation17_spill] sm:$0xff] }
 0x134   :  { %937 = vmatmul.mubr.bf16.vlgmr.msra.gmra.mxu0 %v855_v11 }
 0x135   :  { %1353 = vmatpush3.bf16.msra.mxu0 %v1816_v47  ;;  %1018 = vmatprep.mubr.bf16.mxu0 %v860_v13  ;;  %v843_v47 = vld [vmem:[%s2176_s1 + $0x30] sm:$0xff] }
 0x136   :  { %1354 = vmatprep.subr.bf16.mxu0 %v1828_v49  ;;  %v851_v49 = vld [vmem:[%s2176_s1 + $0x70] sm:$0xff] }
 0x137   :  { %v859_v24 = vpack.c.bf16 %v851_v49, %v843_v47 }
 0x139   :  { %1355 = vmatpush3.bf16.msra.mxu0 %v1840_v51  ;;  %v2216_v51 = vld [vmem:[#allocation18_spill] sm:$0xff] }
 0x13a   :  { %1356 = vmatprep.subr.bf16.mxu0 %v2206_v15 }
 0x13d   :  { %1357 = vmatpush3.bf16.msra.mxu0 %v2207_v17 }
 0x13e   :  { %1358 = vmatprep.subr.bf16.mxu0 %v2208_v19 }
 0x141   :  { %1359 = vmatpush3.bf16.msra.mxu0 %v2209_v21 }
 0x142   :  { %1360 = vmatprep.subr.bf16.mxu0 %v2210_v23 }
 0x144   :  { %v1346_v61 = vpop.f32.mrf.mxu1 }
 0x145   :  { %1361 = vmatpush3.bf16.msra.mxu0 %v2211_v25 }
 0x146   :  { %1362 = vmatprep.subr.bf16.mxu0 %v2212_v27  ;;  %v1347_v63 = vpop.f32.mrf.mxu1 }
 0x147   :  { %v1348_v4 = vadd.f32 %v1347_v63, %v1346_v61 }
 0x148   :  { %v1349_v36 = vpop.f32.mrf.mxu1 }
 0x149   :  { %1363 = vmatpush3.bf16.msra.mxu0 %v2213_v29 }
 0x14a   :  { %1364 = vmatprep.subr.bf16.mxu0 %v2214_v31  ;;  %v1350_v42 = vpop.f32.mrf.mxu1 }
 0x14b   :  { %v1351_v10 = vadd.f32 %v1350_v42, %v1349_v36 }
 0x14d   :  { %1365 = vmatpush3.bf16.msra.mxu0 %v2215_v45 }
 0x14e   :  { %1366 = vmatprep.subr.bf16.mxu0 %v2216_v51 }
 0x151   :  { %1367 = vmatpush3.bf16.msra.mxu0 %v1984_v43 }
 0x154   :  { %1019 = vmatmul.mubr.bf16.vlgmr.msra.gmra.mxu0 %v859_v24 }
 0x1d4   :  { %v813_v28 = vpop.f32.mrf.mxu0 }
 0x1d5   :  { %v814_v30 = vadd.f32 %v2148_v26, %v813_v28 }
 0x1d6   :  { %v1389_v44 = vpop.f32.mrf.mxu0 }
 0x1d7   :  { %v820_v46 = vmul.f32 %v814_v30, %v814_v30 }
 0x1d8   :  { %v816_v48 = vpop.f32.mrf.mxu0 }
 0x1d9   :  { %v817_v50 = vadd.f32 %v2148_v26, %v816_v48  ;;  %v823_v52 = vsel %vm822_vm2, %v820_v46, 0.0 }
 0x1da   :  { %824 = vadd.xlane.f32.xlu0 %v823_v52  ;;  %v1390_v53 = vpop.f32.mrf.mxu0 }
 0x1db   :  { %v821_v43 = vmul.f32 %v817_v50, %v817_v50 }
 0x1dd   :  { %v826_v54 = vsel %vm822_vm2, %v821_v43, 0.0 }
 0x1de   :  { %827 = vadd.xlane.f32.xlu0 %v826_v54 }
 0x1f4   :  { %v1324_v59 = vpop.f32.mrf.mxu0 }
 0x1f6   :  { %v1325_v60 = vpop.f32.mrf.mxu0 }
 0x1f7   :  { %v1326_v39 = vadd.f32 %v1325_v60, %v1324_v59 }
 0x1f8   :  { %v1327_v62 = vpop.f32.mrf.mxu0 }
 0x1f9   :  { %v939_v2 = vadd.f32 %v1326_v39, %v898_v37 }
 0x1fa   :  { %v1328_v34 = vpop.f32.mrf.mxu0 }
 0x1fb   :  { %v1329_v41 = vadd.f32 %v1328_v34, %v1327_v62  ;;  %v980_v16 = vadd.f32 %v1348_v4, %v939_v2 }
 0x1fd   :  { %v942_v8 = vadd.f32 %v1329_v41, %v901_v0 }
 0x1ff   :  { %v983_v18 = vadd.f32 %v1351_v10, %v942_v8 }
 0x214   :  { %v1368_v35 = vpop.f32.mrf.mxu0 }
 0x216   :  { %v1369_v6 = vpop.f32.mrf.mxu0 }
 0x217   :  { %v1370_v12 = vadd.f32 %v1369_v6, %v1368_v35 }
 0x218   :  { %v1371_v14 = vpop.f32.mrf.mxu0 }
 0x219   :  { %v1021_v20 = vadd.f32 %v1370_v12, %v980_v16 }
 0x21a   :  { %v1372_v1 = vpop.f32.mrf.mxu0 }
 0x21b   :  { %v1373_v22 = vadd.f32 %v1372_v1, %v1371_v14  ;;  %v1027_v5 = vmax.f32 %v1021_v20, 0.0 }
 0x21d   :  { %v1024_v3 = vadd.f32 %v1373_v22, %v983_v18 }
 0x21f   :  { %v1028_v7 = vmax.f32 %v1024_v3, 0.0 }
 0x221   :  { %v1029_v9 = vpack.c.bf16 %v1028_v7, %v1027_v5 }
 0x223   :  { %1400 = vmatmul.mubr.msk.bf16.vlgmr.msra.gmra.mxu1 %vm775_vm1, %v1029_v9 }
 0x263   :  { %v825_v11 = vpop.xlane.xlu0 %824 }
 0x264   :  { %v829_v13 = vmax.f32 %v825_v11, 1e-24 }
 0x266   :  { %1477 = vrsqrt.f32 %v829_v13 }
 0x267   :  { %v828_v15 = vpop.xlane.xlu0 %827 }
 0x268   :  { %v830_v17 = vmax.f32 %v828_v15, 1e-24 }
 0x26a   :  { %1479 = vrsqrt.f32 %v830_v17 }
 0x273   :  { %v1478_v19 = vpop.eup %1477 }
 0x274   :  { %v833_v21 = vmul.f32 %v1478_v19, %v814_v30 }
 0x276   :  { %835 = vst.msk [vmem:[#allocation2] sm:$0xff] %vm822_vm2, %v833_v21 }
 0x277   :  { %v1480_v23 = vpop.eup %1479 }
 0x278   :  { %v834_v25 = vmul.f32 %v1480_v23, %v817_v50 }
 0x27a   :  { %836 = vst.msk [vmem:[#allocation2 + $0x8] sm:$0xff] %vm822_vm2, %v834_v25 }
 0x2e3   :  { %v1067_v27 = vpop.f32.mrf.mxu1 }
 0x2e4   :  { %v1068_v29 = vadd.f32 %v2148_v26, %v1067_v27 }
 0x2e5   :  { %v1401_v31 = vpop.f32.mrf.mxu1 }
 0x2e6   :  { %v1074_v45 = vmul.f32 %v1068_v29, %v1068_v29 }
 0x2e7   :  { %v1070_v47 = vpop.f32.mrf.mxu1 }
 0x2e8   :  { %v1071_v49 = vadd.f32 %v2148_v26, %v1070_v47  ;;  %v1076_v51 = vsel %vm822_vm2, %v1074_v45, 0.0 }
 0x2e9   :  { %1077 = vadd.xlane.f32.xlu1 %v1076_v51  ;;  %v1402_v24 = vpop.f32.mrf.mxu1 }
 0x2ea   :  { %v1075_v28 = vmul.f32 %v1071_v49, %v1071_v49 }
 0x2ec   :  { %v1079_v30 = vsel %vm822_vm2, %v1075_v28, 0.0 }
 0x2ed   :  { %1080 = vadd.xlane.f32.xlu1 %v1079_v30 }
 0x2ee   :  { %1496 = shalt.err (!%p1493_p4)
}
 0x2ef   :  { %s1532_s9 = smov 128   ;;  %s1533_s0 = smov 8  }
 0x2f0   :  { %1101 = dma.vmem_to_hbm [thread:$0]  %s1096_s29, 256, %s2182_s7, [#allocation3], %s1532_s9, %s1532_s9, %s1533_s0  }
 0x2f1   :  { %s1534_s2 = smov [#allocation4]  }
 0x2f2   :  { %s1107_s12 = sshll.u32 %s1534_s2, 4  ;;  %s1108_s12 = int_to_ptr.vmem [resolvable:$true] %s1107_s12 }
 0x2f3   :  { %s1505_s13 = scalar_lea.vmem %s1108_s12, 256  ;;  %p1510_p6 = scmp.lt.s32.totalorder %s1108_s12, %s1108_s12 }
 0x2f4   :  { %p1506_p5 = scmp.ne.s32.totalorder %s1108_s12, %s1505_s13  ;;  %p1511_p7 = scmp.lt.s32.totalorder %s1505_s13, %s1505_s13 }
 0x2f6   :  { %p1512_p8 = por %p1511_p7, %p1510_p6 }
 0x2f8   :  { %p1513_p9 = pnand %p1512_p8, %p1506_p5 }
 0x372   :  { %v1078_v26 = vpop.xlane.xlu1 %1077 }
 0x373   :  { %v1082_v44 = vmax.f32 %v1078_v26, 1e-24 }
 0x375   :  { %1481 = vrsqrt.f32 %v1082_v44 }
 0x376   :  { %v1081_v46 = vpop.xlane.xlu1 %1080 }
 0x377   :  { %v1083_v48 = vmax.f32 %v1081_v46, 1e-24 }
 0x379   :  { %1483 = vrsqrt.f32 %v1083_v48 }
 0x382   :  { %v1482_v50 = vpop.eup %1481 }
 0x383   :  { %v1086_v52 = vmul.f32 %v1482_v50, %v1068_v29 }
 0x385   :  { %1088 = vst.msk [vmem:[#allocation4] sm:$0xff] %vm822_vm2, %v1086_v52 }
 0x386   :  { %v1484_v53 = vpop.eup %1483 }
 0x387   :  { %v1087_v43 = vmul.f32 %v1484_v53, %v1071_v49 }
 0x389   :  { %1089 = vst.msk [vmem:[#allocation4 + $0x8] sm:$0xff] %vm822_vm2, %v1087_v43 }
 0x38a   :  { %1516 = shalt.err (!%p1513_p9)
}
 0x38b   :  { %1113 = dma.vmem_to_hbm [thread:$0]  %s1108_s12, 256, %s2183_s8, [#allocation5], %s1532_s9, %s1532_s9, %s1533_s0  }
 0x38c   :  { %1525 = dma.done.wait [#allocation3], 256  }
 0x38d   :  { %1526 = vsyncadd [#allocation3], 4294967040 }
 0x38e   :  { %1527 = dma.done.wait [#allocation5], 256  }
 0x38f   :  { %1528 = vsyncadd [#allocation5], 4294967040 }
 0x390   :  { %1120 = vsyncpa [#allocation3], 1 }
 0x391   :  { %1121 = vsyncpa [#allocation5], 1 }

</bundles_post_ra>
